<compile_context>
chip_gen: v7x
topology: tpu7x:2x2x1
jax: 0.10.0
libtpu: 0.0.40
codegen_flags: <defaults>
</compile_context>

<pallas_src>
import functools

import jax
import jax.numpy as jnp
from jax.experimental import pallas as pl
from jax.experimental.pallas import tpu as pltpu

LANE = 128        # vreg lane width (last dim)
SUBLANE_BF16 = 16 # bf16 packs 16 rows per vreg (second-to-last dim)
TM_MAX = 128      # batch-tile rows per grid step


def _round_up(x, m):
    return (x + m - 1) // m * m


def _pad2(a, rows, cols):
    return jnp.pad(a, ((0, rows - a.shape[0]), (0, cols - a.shape[1])))


def _choose_batch_tiling(batch):
    """Pick (padded_batch, tile) so the grid has >=2 steps when the batch allows it."""
    b_p = _round_up(max(batch, 1), SUBLANE_BF16)
    if b_p > TM_MAX:
        tm = TM_MAX
    elif b_p >= 2 * SUBLANE_BF16:
        tm = _round_up(b_p // 2, SUBLANE_BF16)   # >=2 steps -> both v7x TCs busy
    else:
        tm = b_p                                  # too small to split (16-row pack)
    b_p = _round_up(b_p, tm)
    return b_p, tm


def mlp_kernel(x_ref, w1_ref, b1_ref, w2_ref, b2_ref, w3_ref, b3_ref,
               logits_ref, probs_ref, *, num_classes):
    """One batch tile: x [TM, IN_P] (bf16) -> logits/probs [TM, NCLS_P] (bf16 out)."""
    # ---- fc1 + ReLU (bf16 MXU operands, f32 accumulate, f32 elementwise) ----
    h1 = jnp.dot(x_ref[...], w1_ref[...], preferred_element_type=jnp.float32)
    h1 = jnp.maximum(h1 + b1_ref[...], 0.0)
    # ---- fc2 + ReLU ----
    h2 = jnp.dot(h1.astype(w2_ref.dtype), w2_ref[...],
                 preferred_element_type=jnp.float32)
    h2 = jnp.maximum(h2 + b2_ref[...], 0.0)
    # ---- fc3 (logits) ----
    logits = jnp.dot(h2.astype(w3_ref.dtype), w3_ref[...],
                     preferred_element_type=jnp.float32)
    logits = logits + b3_ref[...]
    logits_ref[...] = logits.astype(logits_ref.dtype)   # bf16 writeback (half bytes)
    # ---- softmax over real classes only ----
    # Pad lanes forced to -1e30; exp is taken on the masked values so pads go to
    # exactly 0 without a second where and without the exp(-m) overflow path.
    col = jax.lax.broadcasted_iota(jnp.int32, logits.shape, 1)
    masked = jnp.where(col < num_classes, logits, -1e30)
    m = jnp.max(masked, axis=1, keepdims=True)
    e = jnp.exp(masked - m)
    denom = jnp.sum(e, axis=1, keepdims=True)
    # Exact reciprocal on the [tm, 1] column: exact row sums, no full-tile divide.
    probs_ref[...] = (e * pl.reciprocal(denom, approx=False)).astype(probs_ref.dtype)


def prepare_params(params):
    """Pad + cast the weights ONCE (hoisted out of the per-forward path)."""
    w1, b1, w2, b2, w3, b3 = params
    in_f, hid = w1.shape
    ncls = w3.shape[1]
    in_p = _round_up(in_f, LANE)
    hid_p = _round_up(hid, LANE)
    ncls_p = _round_up(ncls, LANE)
    padded = (
        _pad2(w1, in_p, hid_p).astype(jnp.bfloat16),
        _pad2(b1, 1, hid_p).astype(jnp.float32),
        _pad2(w2, hid_p, hid_p).astype(jnp.bfloat16),
        _pad2(b2, 1, hid_p).astype(jnp.float32),
        _pad2(w3, hid_p, ncls_p).astype(jnp.bfloat16),
        _pad2(b3, 1, ncls_p).astype(jnp.float32),
    )
    dims = (in_f, hid, ncls, in_p, hid_p, ncls_p)   # static python ints
    return padded, dims


@functools.partial(jax.jit, static_argnums=(2,))
def mlp_forward(x_nchw, padded_params, dims):
    """x_nchw: [B, C, H, W] f32. Returns (logits, probs) f32, each [B, num_classes]."""
    w1_p, b1_p, w2_p, b2_p, w3_p, b3_p = padded_params
    in_f, hid, ncls, in_p, hid_p, ncls_p = dims

    B = x_nchw.shape[0]
    x = x_nchw.reshape(B, -1).astype(jnp.float32)        # x.view(x.size(0), -1)

    b_p, tm = _choose_batch_tiling(B)
    grid = (b_p // tm,)

    # Only the activations are padded/cast per call (weights were hoisted).
    x_p = _pad2(x, b_p, in_p).astype(jnp.bfloat16)

    out_shape = (
        jax.ShapeDtypeStruct((b_p, ncls_p), jnp.bfloat16),   # logits (padded, bf16)
        jax.ShapeDtypeStruct((b_p, ncls_p), jnp.bfloat16),   # probs  (padded, bf16)
    )

    flops = 2 * b_p * (in_p * hid_p + hid_p * hid_p + hid_p * ncls_p)
    bytes_accessed = (
        x_p.size * 2
        + (w1_p.size + w2_p.size + w3_p.size) * 2
        + (b1_p.size + b2_p.size + b3_p.size) * 4
        + 2 * b_p * ncls_p * 2
    )

    fn = pl.pallas_call(
        functools.partial(mlp_kernel, num_classes=ncls),
        out_shape=out_shape,
        grid=grid,
        in_specs=[
            pl.BlockSpec((tm, in_p), lambda i: (i, 0)),       # x streams over batch
            pl.BlockSpec((in_p, hid_p), lambda i: (0, 0)),    # weights VMEM-resident
            pl.BlockSpec((1, hid_p), lambda i: (0, 0)),
            pl.BlockSpec((hid_p, hid_p), lambda i: (0, 0)),
            pl.BlockSpec((1, hid_p), lambda i: (0, 0)),
            pl.BlockSpec((hid_p, ncls_p), lambda i: (0, 0)),
            pl.BlockSpec((1, ncls_p), lambda i: (0, 0)),
        ],
        out_specs=(
            pl.BlockSpec((tm, ncls_p), lambda i: (i, 0)),
            pl.BlockSpec((tm, ncls_p), lambda i: (i, 0)),
        ),
        compiler_params=pltpu.CompilerParams(
            dimension_semantics=("parallel",),   # batch axis sharded across v7x's 2 TCs
        ),
        cost_estimate=pl.CostEstimate(
            flops=flops, transcendentals=b_p * ncls_p, bytes_accessed=bytes_accessed),
    )
    logits_p, probs_p = fn(x_p, w1_p, b1_p, w2_p, b2_p, w3_p, b3_p)

    # Slice the padding back off and restore the caller-facing f32 dtype (glue,
    # outside the kernel; tiny [B, ncls] arrays).
    logits = logits_p[:B, :ncls].astype(jnp.float32)
    probs = probs_p[:B, :ncls].astype(jnp.float32)
    return logits, probs


def init_params(key, input_size, hidden_size, num_classes):
    """Deterministic param init. Weights stored as [in, out] (transpose of PyTorch)."""
    k1, k2, k3, k4, k5, k6 = jax.random.split(key, 6)

    def lin(kw, kb, fan_in, fan_out):
        bound = 1.0 / jnp.sqrt(fan_in)
        w = jax.random.uniform(kw, (fan_in, fan_out), jnp.float32, -bound, bound)
        b = jax.random.uniform(kb, (1, fan_out), jnp.float32, -bound, bound)
        return w, b

    w1, b1 = lin(k1, k2, input_size, hidden_size)
    w2, b2 = lin(k3, k4, hidden_size, hidden_size)
    w3, b3 = lin(k5, k6, hidden_size, num_classes)
    return (w1, b1, w2, b2, w3, b3)


if __name__ == "__main__":
    key = jax.random.PRNGKey(0)
    kx, kp = jax.random.split(key)

    # Small shapes: batch=2, channels=4, spatial=4x4 -> input_size=64
    B, C, H, W = 2, 4, 4, 4
    input_size = C * H * W     # 64
    hidden_size = 32
    num_classes = 10

    x = jax.random.normal(kx, (B, C, H, W), jnp.float32)
    params = init_params(kp, input_size, hidden_size, num_classes)

    # Hoisted: pad/cast the weights once, reuse across every forward call.
    padded_params, dims = prepare_params(params)

    logits, probs = mlp_forward(x, padded_params, dims)
    jax.block_until_ready((logits, probs))

    # Plain-JAX f32 reference.
    w1, b1, w2, b2, w3, b3 = params
    xf = x.reshape(B, -1)
    h1 = jnp.maximum(xf @ w1 + b1, 0.0)
    h2 = jnp.maximum(h1 @ w2 + b2, 0.0)
    ref_logits = h2 @ w3 + b3
    ref_probs = jax.nn.softmax(ref_logits, axis=1)

    assert logits.shape == (B, num_classes) and probs.shape == (B, num_classes)
    # bf16 matmul operands / bf16 output writeback -> bf16-level tolerance vs f32 ref.
    assert jnp.allclose(logits, ref_logits, atol=5e-2, rtol=5e-2), \
        float(jnp.max(jnp.abs(logits - ref_logits)))
    assert jnp.allclose(probs, ref_probs, atol=2e-2, rtol=2e-2), \
        float(jnp.max(jnp.abs(probs - ref_probs)))
    # Masking sanity: the real class columns must sum to ~1 (pads excluded from denom).
    assert jnp.allclose(jnp.sum(probs, axis=1), 1.0, atol=5e-3)

    print("KERNEL_OK")
</pallas_src>

<mosaic_0001>
module attributes {stable_mosaic.version = 11 : i64} {
  func.func @mlp_kernel(%arg0: i32, %arg1: memref<16x128xbf16, #tpu.memory_space<vmem>>, %arg2: memref<128x128xbf16, #tpu.memory_space<vmem>>, %arg3: memref<1x128xf32, #tpu.memory_space<vmem>>, %arg4: memref<128x128xbf16, #tpu.memory_space<vmem>>, %arg5: memref<1x128xf32, #tpu.memory_space<vmem>>, %arg6: memref<128x128xbf16, #tpu.memory_space<vmem>>, %arg7: memref<1x128xf32, #tpu.memory_space<vmem>>, %arg8: memref<16x128xbf16, #tpu.memory_space<vmem>>, %arg9: memref<16x128xbf16, #tpu.memory_space<vmem>>) attributes {dimension_semantics = [#tpu.dimension_semantics<parallel>], iteration_bounds = array<i64: 1>, scalar_prefetch = 0 : i64, scratch_operands = 0 : i64, tpu.core_type = #tpu.core_type<tc>, window_params = [{transform_indices = @transform_0, window_bounds = array<i64: 16, 128>}, {pipeline_mode = #tpu.pipeline_mode<synchronous>, transform_indices = @transform_1, window_bounds = array<i64: 128, 128>}, {pipeline_mode = #tpu.pipeline_mode<synchronous>, transform_indices = @transform_2, window_bounds = array<i64: 1, 128>}, {pipeline_mode = #tpu.pipeline_mode<synchronous>, transform_indices = @transform_3, window_bounds = array<i64: 128, 128>}, {pipeline_mode = #tpu.pipeline_mode<synchronous>, transform_indices = @transform_4, window_bounds = array<i64: 1, 128>}, {pipeline_mode = #tpu.pipeline_mode<synchronous>, transform_indices = @transform_5, window_bounds = array<i64: 128, 128>}, {pipeline_mode = #tpu.pipeline_mode<synchronous>, transform_indices = @transform_6, window_bounds = array<i64: 1, 128>}, {transform_indices = @transform_7, window_bounds = array<i64: 16, 128>}, {transform_indices = @transform_8, window_bounds = array<i64: 16, 128>}]} {
    %c0 = arith.constant 0 : index
    %c0_0 = arith.constant 0 : index
    %0 = vector.load %arg1[%c0, %c0_0] : memref<16x128xbf16, #tpu.memory_space<vmem>>, vector<16x128xbf16>
    %c0_1 = arith.constant 0 : index
    %c0_2 = arith.constant 0 : index
    %1 = vector.load %arg2[%c0_1, %c0_2] : memref<128x128xbf16, #tpu.memory_space<vmem>>, vector<128x128xbf16>
    %cst = arith.constant dense<0.000000e+00> : vector<16x128xf32>
    %2 = tpu.matmul %0, %1, %cst {dimension_numbers = #tpu.dot_dimension_numbers<[1], [0], [0], [1], [0, 0, 1, 1], [], []>} : vector<16x128xbf16>, vector<128x128xbf16>, vector<16x128xf32> -> vector<16x128xf32>
    %c0_3 = arith.constant 0 : index
    %c0_4 = arith.constant 0 : index
    %3 = vector.load %arg3[%c0_3, %c0_4] : memref<1x128xf32, #tpu.memory_space<vmem>>, vector<1x128xf32>
    %4 = vector.broadcast %3 : vector<1x128xf32> to vector<16x128xf32>
    %5 = arith.addf %2, %4 : vector<16x128xf32>
    %cst_5 = arith.constant 0.000000e+00 : f32
    %6 = vector.broadcast %cst_5 : f32 to vector<16x128xf32>
    %7 = arith.maximumf %5, %6 : vector<16x128xf32>
    %8 = arith.truncf %7 : vector<16x128xf32> to vector<16x128xbf16>
    %c0_6 = arith.constant 0 : index
    %c0_7 = arith.constant 0 : index
    %9 = vector.load %arg4[%c0_6, %c0_7] : memref<128x128xbf16, #tpu.memory_space<vmem>>, vector<128x128xbf16>
    %cst_8 = arith.constant dense<0.000000e+00> : vector<16x128xf32>
    %10 = tpu.matmul %8, %9, %cst_8 {dimension_numbers = #tpu.dot_dimension_numbers<[1], [0], [0], [1], [0, 0, 1, 1], [], []>} : vector<16x128xbf16>, vector<128x128xbf16>, vector<16x128xf32> -> vector<16x128xf32>
    %c0_9 = arith.constant 0 : index
    %c0_10 = arith.constant 0 : index
    %11 = vector.load %arg5[%c0_9, %c0_10] : memref<1x128xf32, #tpu.memory_space<vmem>>, vector<1x128xf32>
    %12 = vector.broadcast %11 : vector<1x128xf32> to vector<16x128xf32>
    %13 = arith.addf %10, %12 : vector<16x128xf32>
    %cst_11 = arith.constant 0.000000e+00 : f32
    %14 = vector.broadcast %cst_11 : f32 to vector<16x128xf32>
    %15 = arith.maximumf %13, %14 : vector<16x128xf32>
    %16 = arith.truncf %15 : vector<16x128xf32> to vector<16x128xbf16>
    %c0_12 = arith.constant 0 : index
    %c0_13 = arith.constant 0 : index
    %17 = vector.load %arg6[%c0_12, %c0_13] : memref<128x128xbf16, #tpu.memory_space<vmem>>, vector<128x128xbf16>
    %cst_14 = arith.constant dense<0.000000e+00> : vector<16x128xf32>
    %18 = tpu.matmul %16, %17, %cst_14 {dimension_numbers = #tpu.dot_dimension_numbers<[1], [0], [0], [1], [0, 0, 1, 1], [], []>} : vector<16x128xbf16>, vector<128x128xbf16>, vector<16x128xf32> -> vector<16x128xf32>
    %c0_15 = arith.constant 0 : index
    %c0_16 = arith.constant 0 : index
    %19 = vector.load %arg7[%c0_15, %c0_16] : memref<1x128xf32, #tpu.memory_space<vmem>>, vector<1x128xf32>
    %20 = vector.broadcast %19 : vector<1x128xf32> to vector<16x128xf32>
    %21 = arith.addf %18, %20 : vector<16x128xf32>
    %22 = arith.truncf %21 : vector<16x128xf32> to vector<16x128xbf16>
    %c0_17 = arith.constant 0 : index
    %c0_18 = arith.constant 0 : index
    %23 = vector.load %arg8[%c0_17, %c0_18] : memref<16x128xbf16, #tpu.memory_space<vmem>>, vector<16x128xbf16>
    tpu.vector_store %arg8[%c0_17, %c0_18], %22 {strides = array<i32>} : memref<16x128xbf16, #tpu.memory_space<vmem>>, vector<16x128xbf16>,
    %24 = tpu.iota {dimensions = array<i32: 1>} : vector<16x128xi32>
    %c10_i32 = arith.constant 10 : i32
    %25 = vector.broadcast %c10_i32 : i32 to vector<16x128xi32>
    %26 = arith.cmpi slt, %24, %25 : vector<16x128xi32>
    %cst_19 = arith.constant -1.000000e+30 : f32
    %27 = vector.broadcast %cst_19 : f32 to vector<16x128xf32>
    %28 = arith.select %26, %21, %27 : vector<16x128xi1>, vector<16x128xf32>
    %cst_20 = arith.constant dense<0xFF800000> : vector<16xf32>
    %29 = vector.multi_reduction <maximumf>, %28, %cst_20 [1] : vector<16x128xf32> to vector<16xf32>
    %30 = vector.shape_cast %29 : vector<16xf32> to vector<16x1xf32>
    %31 = vector.broadcast %30 : vector<16x1xf32> to vector<16x128xf32>
    %32 = arith.subf %28, %31 : vector<16x128xf32>
    %33 = math.exp %32 : vector<16x128xf32>
    %cst_21 = arith.constant dense<0.000000e+00> : vector<16xf32>
    %34 = vector.multi_reduction <add>, %33, %cst_21 [1] : vector<16x128xf32> to vector<16xf32>
    %35 = vector.shape_cast %34 : vector<16xf32> to vector<16x1xf32>
    %36 = tpu.reciprocal %35 : vector<16x1xf32> -> vector<16x1xf32>
    %37 = vector.broadcast %36 : vector<16x1xf32> to vector<16x128xf32>
    %38 = arith.mulf %33, %37 : vector<16x128xf32>
    %39 = arith.truncf %38 : vector<16x128xf32> to vector<16x128xbf16>
    %c0_22 = arith.constant 0 : index
    %c0_23 = arith.constant 0 : index
    %40 = vector.load %arg9[%c0_22, %c0_23] : memref<16x128xbf16, #tpu.memory_space<vmem>>, vector<16x128xbf16>
    tpu.vector_store %arg9[%c0_22, %c0_23], %39 {strides = array<i32>} : memref<16x128xbf16, #tpu.memory_space<vmem>>, vector<16x128xbf16>,
    return
  }
  func.func @transform_0(%arg0: i32) -> (i32, i32) {
    %c0_i32 = arith.constant 0 : i32
    %c0_i32_0 = arith.constant 0 : i32
    return %arg0, %c0_i32 : i32, i32
  }
  func.func @transform_1(%arg0: i32) -> (i32, i32) {
    %c0_i32 = arith.constant 0 : i32
    %c0_i32_0 = arith.constant 0 : i32
    %c0_i32_1 = arith.constant 0 : i32
    return %c0_i32, %c0_i32_0 : i32, i32
  }
  func.func @transform_2(%arg0: i32) -> (i32, i32) {
    %c0_i32 = arith.constant 0 : i32
    %c0_i32_0 = arith.constant 0 : i32
    %c0_i32_1 = arith.constant 0 : i32
    return %c0_i32, %c0_i32_0 : i32, i32
  }
  func.func @transform_3(%arg0: i32) -> (i32, i32) {
    %c0_i32 = arith.constant 0 : i32
    %c0_i32_0 = arith.constant 0 : i32
    %c0_i32_1 = arith.constant 0 : i32
    return %c0_i32, %c0_i32_0 : i32, i32
  }
  func.func @transform_4(%arg0: i32) -> (i32, i32) {
    %c0_i32 = arith.constant 0 : i32
    %c0_i32_0 = arith.constant 0 : i32
    %c0_i32_1 = arith.constant 0 : i32
    return %c0_i32, %c0_i32_0 : i32, i32
  }
  func.func @transform_5(%arg0: i32) -> (i32, i32) {
    %c0_i32 = arith.constant 0 : i32
    %c0_i32_0 = arith.constant 0 : i32
    %c0_i32_1 = arith.constant 0 : i32
    return %c0_i32, %c0_i32_0 : i32, i32
  }
  func.func @transform_6(%arg0: i32) -> (i32, i32) {
    %c0_i32 = arith.constant 0 : i32
    %c0_i32_0 = arith.constant 0 : i32
    %c0_i32_1 = arith.constant 0 : i32
    return %c0_i32, %c0_i32_0 : i32, i32
  }
  func.func @transform_7(%arg0: i32) -> (i32, i32) {
    %c0_i32 = arith.constant 0 : i32
    %c0_i32_0 = arith.constant 0 : i32
    return %arg0, %c0_i32 : i32, i32
  }
  func.func @transform_8(%arg0: i32) -> (i32, i32) {
    %c0_i32 = arith.constant 0 : i32
    %c0_i32_0 = arith.constant 0 : i32
    return %arg0, %c0_i32 : i32, i32
  }
}

</mosaic_0001>

<bundles_post_ra>
// kernel: mlp_forward.1
= control target key start
LH: loop header
LB: loop body
LE: loop exit
PB: predicated region body
PF: predicated region fallthrough
CT: control target
= control target key end

     0   :  { %14 = vsyncpa [#allocation3], 0  ;;  %s827_s0 = inlined_call_operand.vmem [shape: bf16[16,128], index: 0, kind: input, shape index: {}]   ;;  %s828_s1 = inlined_call_operand.vmem [shape: bf16[128,128], index: 1, kind: input, shape index: {}]   ;;  %s829_s2 = inlined_call_operand.vmem [shape: f32[1,128], index: 2, kind: input, shape index: {}]   ;;  %s830_s3 = inlined_call_operand.hbm [shape: bf16[128,128], index: 3, kind: input, shape index: {}]   ;;  %s831_s4 = inlined_call_operand.vmem [shape: f32[1,128], index: 4, kind: input, shape index: {}]   ;;  %s832_s5 = inlined_call_operand.hbm [shape: bf16[128,128], index: 5, kind: input, shape index: {}]   ;;  %s833_s6 = inlined_call_operand.vmem [shape: f32[1,128], index: 6, kind: input, shape index: {}]   ;;  %s834_s7 = inlined_call_operand.vmem [shape: bf16[16,128], index: 7, kind: output, shape index: {0}]   ;;  %s835_s8 = inlined_call_operand.vmem [shape: bf16[16,128], index: 8, kind: output, shape index: {1}]  }
   0x1   :  { %15 = vsyncpa [#allocation5], 0  ;;  %s680_s27 = smov [#allocation2]   ;;  %s632_s9 = scalar_lea.hbm %s830_s3, 1024 }
   0x2   :  { %s27_s28 = sshll.u32 %s680_s27, 4  ;;  %p633_p0 = scmp.ne.s32.totalorder %s830_s3, %s632_s9  ;;  %s28_s28 = int_to_ptr.vmem [resolvable:$true] %s27_s28 }
   0x3   :  { %p636_p1 = scmp.lt.u32.totalorder %s632_s9, %s830_s3 }
   0x5   :  { %p638_p2 = pnand %p636_p1, %p633_p0 }
   0x7   :  { %641 = shalt.err (!%p638_p2)
}
   0x8   :  { %s642_s14 = scalar_lea.vmem %s28_s28, 1024  ;;  %p647_p4 = scmp.lt.s32.totalorder %s28_s28, %s28_s28 }
   0x9   :  { %p643_p3 = scmp.ne.s32.totalorder %s28_s28, %s642_s14  ;;  %p648_p5 = scmp.lt.s32.totalorder %s642_s14, %s642_s14 }
   0xb   :  { %p649_p6 = por %p648_p5, %p647_p4 }
   0xd   :  { %p650_p7 = pnand %p649_p6, %p643_p3 }
   0xf   :  { %653 = shalt.err (!%p650_p7)
}
  0x10   :  { %s681_s15 = smov 64   ;;  %s682_s16 = smov 4  }
  0x11   :  { %33 = dma.hbm_to_vmem [thread:$0]  %s830_s3, 1024, %s28_s28, [#allocation3], %s681_s15, %s681_s15, %s682_s16  }
  0x12   :  { %s683_s19 = smov [#allocation4]   ;;  %s654_s23 = scalar_lea.hbm %s832_s5, 1024 }
  0x13   :  { %s41_s20 = sshll.u32 %s683_s19, 4  ;;  %p655_p8 = scmp.ne.s32.totalorder %s832_s5, %s654_s23  ;;  %s42_s20 = int_to_ptr.vmem [resolvable:$true] %s41_s20 }
  0x14   :  { %p658_p9 = scmp.lt.u32.totalorder %s654_s23, %s832_s5 }
  0x16   :  { %p660_p10 = pnand %p658_p9, %p655_p8 }
  0x18   :  { %663 = shalt.err (!%p660_p10)
}
  0x19   :  { %s664_s29 = scalar_lea.vmem %s42_s20, 1024  ;;  %p669_p12 = scmp.lt.s32.totalorder %s42_s20, %s42_s20 }
  0x1a   :  { %p665_p11 = scmp.ne.s32.totalorder %s42_s20, %s664_s29  ;;  %p670_p13 = scmp.lt.s32.totalorder %s664_s29, %s664_s29 }
  0x1c   :  { %p671_p0 = por %p670_p13, %p669_p12 }
  0x1e   :  { %p672_p1 = pnand %p671_p0, %p665_p11 }
  0x20   :  { %675 = shalt.err (!%p672_p1)
}
  0x21   :  { %47 = dma.hbm_to_vmem [thread:$0]  %s832_s5, 1024, %s42_s20, [#allocation5], %s681_s15, %s681_s15, %s682_s16  }
  0x22   :  { %676 = dma.done.wait [#allocation3], 1024  }
  0x23   :  { %677 = vsyncadd [#allocation3], 4294966272 }
  0x24   :  { %678 = dma.done.wait [#allocation5], 1024  }
  0x25   :  { %679 = vsyncadd [#allocation5], 4294966272  ;;  %v684_v0 = vmov 0.0   ;;  %vm685_vm0 = vmmov 0   ;;  %v599_v1 = vld [vmem:[%s828_s1] sm:$0xff]   ;;  %v600_v2 = vld [vmem:[%s828_s1 + $0x8] sm:$0xff]   ;;  %v417_v46 = vlaneseq }
  0x26   :  { %533 = vmatprep.subr.bf16.mxu0 %v684_v0  ;;  %549 = vmatprep.mubr.msk.bf16.mxu0 %vm685_vm0, %v684_v0  ;;  %v601_v3 = vld [vmem:[%s828_s1 + $0x10] sm:$0xff]   ;;  %v608_v4 = vld [vmem:[#allocation2] sm:$0xff]   ;;  %v602_v5 = vld [vmem:[%s828_s1 + $0x18] sm:$0xff]  }
  0x27   :  { %553 = vmatprep.subr.bf16.mxu1 %v684_v0  ;;  %569 = vmatprep.mubr.msk.bf16.mxu1 %vm685_vm0, %v684_v0  ;;  %v609_v6 = vld [vmem:[#allocation2 + $0x8] sm:$0xff]   ;;  %v603_v7 = vld [vmem:[%s828_s1 + $0x20] sm:$0xff]   ;;  %v610_v8 = vld [vmem:[#allocation2 + $0x10] sm:$0xff]   ;;  %v418_v47 = vand.u32 127, %v417_v46 }
  0x28   :  { %534 = vmatpush3.bf16.msra.mxu0 %v599_v1  ;;  %554 = vmatpush3.bf16.msra.mxu1 %v608_v4  ;;  %v604_v9 = vld [vmem:[%s828_s1 + $0x28] sm:$0xff]   ;;  %v611_v10 = vld [vmem:[#allocation2 + $0x18] sm:$0xff]   ;;  %v605_v11 = vld [vmem:[%s828_s1 + $0x30] sm:$0xff]  }
  0x29   :  { %535 = vmatprep.subr.bf16.mxu0 %v684_v0  ;;  %555 = vmatprep.subr.bf16.mxu1 %v684_v0  ;;  %v612_v12 = vld [vmem:[#allocation2 + $0x20] sm:$0xff]   ;;  %v606_v13 = vld [vmem:[%s828_s1 + $0x38] sm:$0xff]   ;;  %v613_v14 = vld [vmem:[#allocation2 + $0x28] sm:$0xff]   ;;  %vm419_vm1 = vcmp.lt.s32.totalorder %v418_v47, 10 }
  0x2a   :  { %v607_v15 = vld [vmem:[%s827_s0] sm:$0xff]   ;;  %v614_v16 = vld [vmem:[#allocation2 + $0x30] sm:$0xff]   ;;  %v615_v17 = vld [vmem:[#allocation2 + $0x38] sm:$0xff]  }
  0x2b   :  { %v616_v18 = vld [vmem:[#allocation4] sm:$0xff]   ;;  %v617_v19 = vld [vmem:[#allocation4 + $0x8] sm:$0xff]   ;;  %v618_v20 = vld [vmem:[#allocation4 + $0x10] sm:$0xff]  }
  0x2c   :  { %536 = vmatpush3.bf16.msra.mxu0 %v600_v2  ;;  %556 = vmatpush3.bf16.msra.mxu1 %v609_v6  ;;  %v619_v21 = vld [vmem:[#allocation4 + $0x18] sm:$0xff]   ;;  %v620_v22 = vld [vmem:[#allocation4 + $0x20] sm:$0xff]   ;;  %v621_v23 = vld [vmem:[#allocation4 + $0x28] sm:$0xff]  }
  0x2d   :  { %537 = vmatprep.subr.bf16.mxu0 %v684_v0  ;;  %557 = vmatprep.subr.bf16.mxu1 %v684_v0  ;;  %v460_v24 = vld [vmem:[%s829_s2] ss:$0 sm:$0xff]  ;;  %v622_v34 = vld [vmem:[#allocation4 + $0x30] sm:$0xff]   ;;  %v623_v35 = vld [vmem:[#allocation4 + $0x38] sm:$0xff]  }
  0x2e   :  { %v470_v36 = vld [vmem:[%s831_s4] ss:$0 sm:$0xff] }
  0x2f   :  { %v479_v48 = vld [vmem:[%s833_s6] ss:$0 sm:$0xff] }
  0x30   :  { %538 = vmatpush3.bf16.msra.mxu0 %v601_v3  ;;  %558 = vmatpush3.bf16.msra.mxu1 %v610_v8 }
  0x31   :  { %539 = vmatprep.subr.bf16.mxu0 %v684_v0  ;;  %559 = vmatprep.subr.bf16.mxu1 %v684_v0 }
  0x34   :  { %540 = vmatpush3.bf16.msra.mxu0 %v602_v5  ;;  %560 = vmatpush3.bf16.msra.mxu1 %v611_v10 }
  0x35   :  { %541 = vmatprep.subr.bf16.mxu0 %v684_v0  ;;  %561 = vmatprep.subr.bf16.mxu1 %v684_v0 }
  0x38   :  { %542 = vmatpush3.bf16.msra.mxu0 %v603_v7  ;;  %562 = vmatpush3.bf16.msra.mxu1 %v612_v12 }
  0x39   :  { %543 = vmatprep.subr.bf16.mxu0 %v684_v0  ;;  %563 = vmatprep.subr.bf16.mxu1 %v684_v0 }
  0x3c   :  { %544 = vmatpush3.bf16.msra.mxu0 %v604_v9  ;;  %564 = vmatpush3.bf16.msra.mxu1 %v613_v14 }
  0x3d   :  { %545 = vmatprep.subr.bf16.mxu0 %v684_v0  ;;  %565 = vmatprep.subr.bf16.mxu1 %v684_v0 }
  0x40   :  { %546 = vmatpush3.bf16.msra.mxu0 %v605_v11  ;;  %566 = vmatpush3.bf16.msra.mxu1 %v614_v16 }
  0x41   :  { %547 = vmatprep.subr.bf16.mxu0 %v684_v0  ;;  %567 = vmatprep.subr.bf16.mxu1 %v684_v0 }
  0x44   :  { %548 = vmatpush3.bf16.msra.mxu0 %v606_v13  ;;  %568 = vmatpush3.bf16.msra.mxu1 %v615_v17 }
  0x45   :  { %573 = vmatprep.subr.bf16.mxu0 %v684_v0 }
  0x47   :  { %550 = vmatmul.mubr.bf16.vlgmr.msra.gmra.mrb[0].mxu0 %v607_v15 }
  0x48   :  { %589 = vmatprep.mubr.msk.bf16.mxu0 %vm685_vm0, %v684_v0  ;;  %574 = vmatpush3.bf16.msra.mxu0 %v616_v18 }
  0x49   :  { %575 = vmatprep.subr.bf16.mxu0 %v684_v0 }
  0x4c   :  { %576 = vmatpush3.bf16.msra.mxu0 %v617_v19 }
  0x4d   :  { %577 = vmatprep.subr.bf16.mxu0 %v684_v0 }
  0x50   :  { %578 = vmatpush3.bf16.msra.mxu0 %v618_v20 }
  0x51   :  { %579 = vmatprep.subr.bf16.mxu0 %v684_v0 }
  0x54   :  { %580 = vmatpush3.bf16.msra.mxu0 %v619_v21 }
  0x55   :  { %581 = vmatprep.subr.bf16.mxu0 %v684_v0 }
  0x58   :  { %582 = vmatpush3.bf16.msra.mxu0 %v620_v22 }
  0x59   :  { %583 = vmatprep.subr.bf16.mxu0 %v684_v0 }
  0x5c   :  { %584 = vmatpush3.bf16.msra.mxu0 %v621_v23 }
  0x5d   :  { %585 = vmatprep.subr.bf16.mxu0 %v684_v0 }
  0x60   :  { %586 = vmatpush3.bf16.msra.mxu0 %v622_v34 }
  0x61   :  { %587 = vmatprep.subr.bf16.mxu0 %v684_v0 }
  0x64   :  { %588 = vmatpush3.bf16.msra.mxu0 %v623_v35 }
 0x11a   :  { %v170_v25 = vpop.f32.mrb[0].mxu0 }
 0x11b   :  { %v171_v26 = vadd.f32 %v460_v24, %v170_v25  ;;  %v551_v27 = vpop.f32.mrb[1].mxu0 }
 0x11c   :  { %v173_v28 = vpop.f32.mrb[2].mxu0 }
 0x11d   :  { %v174_v29 = vadd.f32 %v460_v24, %v173_v28  ;;  %v552_v30 = vpop.f32.mrb[3].mxu0  ;;  %v177_v31 = vmax.f32 %v171_v26, 0.0 }
 0x11f   :  { %v178_v32 = vmax.f32 %v174_v29, 0.0 }
 0x121   :  { %v179_v33 = vpack.c.bf16 %v178_v32, %v177_v31 }
 0x123   :  { %570 = vmatmul.mubr.bf16.vlgmr.msra.gmra.mrb[0].mxu1 %v179_v33 }
 0x1f6   :  { %v285_v37 = vpop.f32.mrb[0].mxu1 }
 0x1f7   :  { %v286_v38 = vadd.f32 %v470_v36, %v285_v37  ;;  %v571_v39 = vpop.f32.mrb[1].mxu1 }
 0x1f8   :  { %v288_v40 = vpop.f32.mrb[2].mxu1 }
 0x1f9   :  { %v289_v41 = vadd.f32 %v470_v36, %v288_v40  ;;  %v572_v42 = vpop.f32.mrb[3].mxu1  ;;  %v292_v43 = vmax.f32 %v286_v38, 0.0 }
 0x1fb   :  { %v293_v44 = vmax.f32 %v289_v41, 0.0 }
 0x1fd   :  { %v294_v45 = vpack.c.bf16 %v293_v44, %v292_v43 }
 0x1ff   :  { %590 = vmatmul.mubr.bf16.vlgmr.msra.gmra.mrb[4].mxu0 %v294_v45 }
 0x2d2   :  { %v400_v49 = vpop.f32.mrb[4].mxu0 }
 0x2d3   :  { %v401_v50 = vadd.f32 %v479_v48, %v400_v49  ;;  %v591_v51 = vpop.f32.mrb[5].mxu0 }
 0x2d4   :  { %v403_v52 = vpop.f32.mrb[6].mxu0 }
 0x2d5   :  { %v404_v53 = vadd.f32 %v479_v48, %v403_v52  ;;  %v592_v54 = vpop.f32.mrb[7].mxu0  ;;  %v420_v55 = vsel %vm419_vm1, %v401_v50, -1e+30 }
 0x2d6   :  { %422 = vmax.xlane.f32.xlu0 %v420_v55 }
 0x2d7   :  { %v499_v56 = vpack.c.bf16 %v404_v53, %v401_v50  ;;  %v421_v57 = vsel %vm419_vm1, %v404_v53, -1e+30 }
 0x2d9   :  { %500 = vst [vmem:[%s834_s7] sm:$0xff] %v499_v56  }
 0x2da   :  { %424 = vmax.xlane.f32.xlu0 %v421_v57 }
 0x363   :  { %v423_v58 = vpop.xlane.xlu0 %422 }
 0x364   :  { %v426_v59 = vsub.f32 %v420_v55, %v423_v58 }
 0x366   :  { %v428_v60 = vmul.f32 1.442695, %v426_v59 }
 0x367   :  { %v425_v61 = vpop.xlane.xlu0 %424 }
 0x368   :  { %624 = vpow2.f32 %v428_v60  ;;  %v427_v62 = vsub.f32 %v421_v57, %v425_v61 }
 0x36a   :  { %v430_v63 = vmul.f32 1.442695, %v427_v62 }
 0x36c   :  { %626 = vpow2.f32 %v430_v63 }
 0x372   :  { %v625_v0 = vpop.eup %624 }
 0x373   :  { %432 = vadd.xlane.f32.xlu1 %v625_v0 }
 0x376   :  { %v627_v1 = vpop.eup %626 }
 0x377   :  { %434 = vadd.xlane.f32.xlu1 %v627_v1 }
 0x400   :  { %v433_v2 = vpop.xlane.xlu1 %432 }
 0x401   :  { %628 = vrcp.f32 %v433_v2 }
 0x404   :  { %v435_v3 = vpop.xlane.xlu1 %434 }
 0x405   :  { %630 = vrcp.f32 %v435_v3 }
 0x40b   :  { %v629_v4 = vpop.eup %628 }
 0x40c   :  { %v438_v6 = vmul.f32 %v629_v4, %v625_v0 }
 0x40f   :  { %v631_v5 = vpop.eup %630 }
 0x410   :  { %v439_v7 = vmul.f32 %v631_v5, %v627_v1 }
 0x412   :  { %v504_v8 = vpack.c.bf16 %v439_v7, %v438_v6 }
 0x414   :  { %505 = vst [vmem:[%s835_s8] sm:$0xff] %v504_v8  }
 0x415   :  { %458 = vsyncpa [#allocation3], 1 }
 0x416   :  { %459 = vsyncpa [#allocation5], 1 }

</bundles_post_ra>
